<compile_context>
chip_gen: v7x
topology: tpu7x:2x2x1
jax: 0.10.0
libtpu: 0.0.40
codegen_flags: <defaults>
</compile_context>

<pallas_src>
import functools

import jax
import jax.numpy as jnp
from jax.experimental import pallas as pl
from jax.experimental.pallas import tpu as pltpu


def _std_loss_kernel(seg_ref, x_ref, o_ref, *, h, w, n_terms):
    """One grid step: unbiased std of row means for TG groups."""
    xb = x_ref[...].astype(jnp.float32)              # (TG, H*W), lane-dense
    seg = seg_ref[...]                               # (H*W, H), bf16 {0, 1}

    # Exact f32 row sums via bf16 MXU passes (x split into bf16 terms).
    row_sum = jnp.zeros((xb.shape[0], h), jnp.float32)
    resid = xb
    for _ in range(n_terms):
        term = resid.astype(jnp.bfloat16)
        row_sum = row_sum + jnp.dot(term, seg, preferred_element_type=jnp.float32)
        resid = resid - term.astype(jnp.float32)

    row_mean = row_sum * (1.0 / w)                   # (TG, H)

    mu = jnp.mean(row_mean, axis=-1, keepdims=True)  # (TG, 1)
    d = row_mean - mu
    var = jnp.sum(d * d, axis=-1, keepdims=True) * (1.0 / (h - 1))
    o_ref[...] = jnp.sqrt(var)                       # (TG, 1) per-group std


def std_loss(x, *, target_tile_bytes=2 * 1024 * 1024):
    """mean(x, -1).std(-1, ddof=1).mean() in a single Pallas pass over x."""
    if x.ndim < 2:
        raise ValueError("STDLoss expects at least 2 dims (..., H, W)")
    h, w = int(x.shape[-2]), int(x.shape[-1])
    if h < 2:
        raise ValueError("unbiased std over dim -2 requires H >= 2")

    hw = h * w
    g = 1
    for d in x.shape[:-2]:
        g *= int(d)

    # Lane-dense presentation; keep native dtype (no f32 copy in HBM).
    xr = x.reshape(g, hw)
    itemsize = xr.dtype.itemsize
    bytes_per_group = hw * itemsize

    # TG groups per step: ~2 MiB per input buffer (near HBM roofline, fits every
    # generation's scoped VMEM including v7x), sublane-aligned (multiple of 8).
    tg = (target_tile_bytes // bytes_per_group) // 8 * 8
    tg = int(max(8, tg))
    tg = int(min(tg, 8 * pl.cdiv(g, 8)))             # don't exceed (padded) problem
    num_chunks = int(pl.cdiv(g, tg))
    g_pad = num_chunks * tg
    if g_pad != g:
        # Zero groups have row-mean 0 and std exactly 0 -> contribute nothing;
        # the final division uses the true G.
        xr = jnp.pad(xr, ((0, g_pad - g), (0, 0)))

    # Static {0,1} segment matrix mapping flattened (H*W) lanes -> H row sums.
    seg = (jnp.arange(hw, dtype=jnp.int32)[:, None] // w
           == jnp.arange(h, dtype=jnp.int32)[None, :]).astype(jnp.bfloat16)

    # f32 inputs need 3 bf16 terms for exact row sums; bf16 inputs need 1.
    n_terms = 1 if xr.dtype == jnp.bfloat16 else 3

    tile_bytes = tg * hw * itemsize
    use_deep_pipeline = num_chunks >= 3
    x_spec_kwargs = {}
    if use_deep_pipeline:
        # DMA-latency bound: deeper input buffering hides issue/tail latency.
        x_spec_kwargs["pipeline_mode"] = pl.Buffered(3)

    in_specs = [
        pl.BlockSpec((hw, h), lambda i: (0, 0)),                    # seg: resident
        pl.BlockSpec((tg, hw), lambda i: (i, 0), **x_spec_kwargs),  # x tile
    ]
    out_specs = pl.BlockSpec((tg, 1), lambda i: (i, 0))

    num_buffers = 3 if use_deep_pipeline else 2
    vmem_limit = int(max(32 * 1024 * 1024,
                         (num_buffers + 6) * tile_bytes + 4 * 1024 * 1024))

    cost = pl.CostEstimate(
        flops=int(2 * n_terms * g_pad * hw * h + 8 * g_pad * h),
        transcendentals=int(g_pad),
        bytes_accessed=int(g_pad * hw * itemsize + hw * h * 2 + g_pad * 4),
    )

    per_group_std = pl.pallas_call(
        functools.partial(_std_loss_kernel, h=h, w=w, n_terms=n_terms),
        out_shape=jax.ShapeDtypeStruct((g_pad, 1), jnp.float32),
        grid_spec=pltpu.PrefetchScalarGridSpec(
            num_scalar_prefetch=0,
            grid=(num_chunks,),
            in_specs=in_specs,
            out_specs=out_specs,
        ),
        compiler_params=pltpu.CompilerParams(
            dimension_semantics=("parallel",),   # disjoint outputs -> megacore-splittable
            vmem_limit_bytes=vmem_limit,
        ),
        cost_estimate=cost,
    )(seg, xr)

    # Final mean over the true number of groups (padded groups contribute 0).
    return jnp.sum(per_group_std) / g


def _std_loss_ref(x):
    m = jnp.mean(x, axis=-1)
    s = jnp.std(m, axis=-1, ddof=1)   # torch .std() default: unbiased (ddof=1)
    return jnp.mean(s)


if __name__ == "__main__":
    key = jax.random.PRNGKey(0)
    x = jax.random.normal(key, (2, 4, 16, 16), dtype=jnp.float32)  # NCHW

    result = std_loss(x)
    result = jax.block_until_ready(result)

    ref = _std_loss_ref(x.astype(jnp.float32))
    assert jnp.allclose(result, ref, rtol=1e-5, atol=1e-6), (result, ref)

    print("KERNEL_OK")
</pallas_src>

<mosaic_0001>
module attributes {stable_mosaic.version = 11 : i64} {
  func.func @_std_loss_kernel(%arg0: i32, %arg1: memref<256x16xbf16, #tpu.memory_space<vmem>>, %arg2: memref<8x256xf32, #tpu.memory_space<vmem>>, %arg3: memref<8x1xf32, #tpu.memory_space<vmem>>) attributes {dimension_semantics = [#tpu.dimension_semantics<parallel>], iteration_bounds = array<i64: 1>, scalar_prefetch = 0 : i64, scratch_operands = 0 : i64, tpu.core_type = #tpu.core_type<tc>, window_params = [{pipeline_mode = #tpu.pipeline_mode<synchronous>, transform_indices = @transform_0, window_bounds = array<i64: 256, 16>}, {transform_indices = @transform_1, window_bounds = array<i64: 8, 256>}, {transform_indices = @transform_2, window_bounds = array<i64: 8, 1>}]} {
    %c0 = arith.constant 0 : index
    %c0_0 = arith.constant 0 : index
    %0 = vector.load %arg2[%c0, %c0_0] : memref<8x256xf32, #tpu.memory_space<vmem>>, vector<8x256xf32>
    %c0_1 = arith.constant 0 : index
    %c0_2 = arith.constant 0 : index
    %1 = vector.load %arg1[%c0_1, %c0_2] : memref<256x16xbf16, #tpu.memory_space<vmem>>, vector<256x16xbf16>
    %cst = arith.constant 0.000000e+00 : f32
    %2 = vector.broadcast %cst : f32 to vector<8x16xf32>
    %3 = arith.truncf %0 : vector<8x256xf32> to vector<8x256xbf16>
    %cst_3 = arith.constant dense<0.000000e+00> : vector<8x16xf32>
    %4 = tpu.matmul %3, %1, %cst_3 {dimension_numbers = #tpu.dot_dimension_numbers<[1], [0], [0], [1], [0, 0, 1, 1], [], []>} : vector<8x256xbf16>, vector<256x16xbf16>, vector<8x16xf32> -> vector<8x16xf32>
    %5 = arith.addf %2, %4 : vector<8x16xf32>
    %6 = arith.extf %3 : vector<8x256xbf16> to vector<8x256xf32>
    %7 = arith.subf %0, %6 : vector<8x256xf32>
    %8 = arith.truncf %7 : vector<8x256xf32> to vector<8x256xbf16>
    %cst_4 = arith.constant dense<0.000000e+00> : vector<8x16xf32>
    %9 = tpu.matmul %8, %1, %cst_4 {dimension_numbers = #tpu.dot_dimension_numbers<[1], [0], [0], [1], [0, 0, 1, 1], [], []>} : vector<8x256xbf16>, vector<256x16xbf16>, vector<8x16xf32> -> vector<8x16xf32>
    %10 = arith.addf %5, %9 : vector<8x16xf32>
    %11 = arith.extf %8 : vector<8x256xbf16> to vector<8x256xf32>
    %12 = arith.subf %7, %11 : vector<8x256xf32>
    %13 = arith.truncf %12 : vector<8x256xf32> to vector<8x256xbf16>
    %cst_5 = arith.constant dense<0.000000e+00> : vector<8x16xf32>
    %14 = tpu.matmul %13, %1, %cst_5 {dimension_numbers = #tpu.dot_dimension_numbers<[1], [0], [0], [1], [0, 0, 1, 1], [], []>} : vector<8x256xbf16>, vector<256x16xbf16>, vector<8x16xf32> -> vector<8x16xf32>
    %15 = arith.addf %10, %14 : vector<8x16xf32>
    %cst_6 = arith.constant 6.250000e-02 : f32
    %16 = vector.broadcast %cst_6 : f32 to vector<8x16xf32>
    %17 = arith.mulf %15, %16 : vector<8x16xf32>
    %cst_7 = arith.constant dense<0.000000e+00> : vector<8xf32>
    %18 = vector.multi_reduction <add>, %17, %cst_7 [1] : vector<8x16xf32> to vector<8xf32>
    %19 = vector.shape_cast %18 : vector<8xf32> to vector<8x1xf32>
    %cst_8 = arith.constant 1.600000e+01 : f32
    %20 = vector.broadcast %cst_8 : f32 to vector<8x1xf32>
    %21 = arith.divf %19, %20 : vector<8x1xf32>
    %22 = vector.broadcast %21 : vector<8x1xf32> to vector<8x16xf32>
    %23 = arith.subf %17, %22 : vector<8x16xf32>
    %24 = arith.mulf %23, %23 : vector<8x16xf32>
    %cst_9 = arith.constant dense<0.000000e+00> : vector<8xf32>
    %25 = vector.multi_reduction <add>, %24, %cst_9 [1] : vector<8x16xf32> to vector<8xf32>
    %26 = vector.shape_cast %25 : vector<8xf32> to vector<8x1xf32>
    %cst_10 = arith.constant 0.0666666701 : f32
    %27 = vector.broadcast %cst_10 : f32 to vector<8x1xf32>
    %28 = arith.mulf %26, %27 : vector<8x1xf32>
    %29 = math.sqrt %28 : vector<8x1xf32>
    %c0_11 = arith.constant 0 : index
    %c0_12 = arith.constant 0 : index
    %30 = vector.load %arg3[%c0_11, %c0_12] : memref<8x1xf32, #tpu.memory_space<vmem>>, vector<8x1xf32>
    tpu.vector_store %arg3[%c0_11, %c0_12], %29 {strides = array<i32>} : memref<8x1xf32, #tpu.memory_space<vmem>>, vector<8x1xf32>,
    return
  }
  func.func @transform_0(%arg0: i32) -> (i32, i32) {
    %c0_i32 = arith.constant 0 : i32
    %c0_i32_0 = arith.constant 0 : i32
    %c0_i32_1 = arith.constant 0 : i32
    return %c0_i32, %c0_i32_0 : i32, i32
  }
  func.func @transform_1(%arg0: i32) -> (i32, i32) {
    %c0_i32 = arith.constant 0 : i32
    %c0_i32_0 = arith.constant 0 : i32
    return %arg0, %c0_i32 : i32, i32
  }
  func.func @transform_2(%arg0: i32) -> (i32, i32) {
    %c0_i32 = arith.constant 0 : i32
    %c0_i32_0 = arith.constant 0 : i32
    return %arg0, %c0_i32 : i32, i32
  }
}

</mosaic_0001>

<bundles_post_ra>
// kernel: tpu_custom_call.1
= control target key start
LH: loop header
LB: loop body
LE: loop exit
PB: predicated region body
PF: predicated region fallthrough
CT: control target
= control target key end

     0   :  { %vm278_vm0 = vcmask 130048   ;;  %vm297_vm1 = vcmask 7168   ;;  %s490_s0 = inlined_call_operand.vmem [shape: bf16[256,16], index: 0, kind: input, shape index: {}]   ;;  %s491_s1 = inlined_call_operand.vmem [shape: f32[8,256], index: 1, kind: input, shape index: {}]   ;;  %s492_s2 = inlined_call_operand.vmem [shape: f32[8,1], index: 2, kind: output, shape index: {}]  }
   0x1   :  { %v421_v0 = vld [vmem:[%s490_s0 + $0x40] sm:$0xff]   ;;  %v433_v2 = vld [vmem:[%s490_s0 + $0x48] sm:$0xff]   ;;  %v389_v4 = vld [vmem:[%s490_s0 + $0x50] sm:$0xff]  }
   0x2   :  { %v426_v1 = vld [vmem:[%s490_s0] sm:$0xff]   ;;  %319 = vmatprep.subr.bf16.mxu0 %v421_v0  ;;  %341 = vmatprep.subr.bf16.mxu1 %v421_v0  ;;  %v388_v3 = vld [vmem:[%s490_s0 + $0x8] sm:$0xff]   ;;  %v390_v5 = vld [vmem:[%s490_s0 + $0x10] sm:$0xff]  }
   0x3   :  { %320 = vmatpush3.bf16.msra.mxu0 %v426_v1  ;;  %342 = vmatpush3.bf16.msra.mxu1 %v426_v1  ;;  %v391_v6 = vld [vmem:[%s490_s0 + $0x58] sm:$0xff]   ;;  %v393_v8 = vld [vmem:[%s490_s0 + $0x60] sm:$0xff]   ;;  %v395_v10 = vld [vmem:[%s490_s0 + $0x68] sm:$0xff]  }
   0x4   :  { %321 = vmatprep.subr.bf16.mxu0 %v433_v2  ;;  %343 = vmatprep.subr.bf16.mxu1 %v433_v2  ;;  %v392_v7 = vld [vmem:[%s490_s0 + $0x18] sm:$0xff]   ;;  %v394_v9 = vld [vmem:[%s490_s0 + $0x20] sm:$0xff]   ;;  %v13_v12 = vld [vmem:[%s491_s1 + $0x8] sm:$0xff] }
   0x5   :  { %v12_v11 = vld [vmem:[%s491_s1] sm:$0xff]  ;;  %v47_v13 = vpack.c.bf16 %v13_v12, %v13_v12  ;;  %v396_v15 = vld [vmem:[%s490_s0 + $0x28] sm:$0xff]   ;;  %v397_v17 = vld [vmem:[%s490_s0 + $0x70] sm:$0xff]  }
   0x6   :  { %v46_v14 = vpack.c.bf16 %v12_v11, %v12_v11  ;;  %v398_v20 = vld [vmem:[%s490_s0 + $0x30] sm:$0xff]   ;;  %v399_v22 = vld [vmem:[%s490_s0 + $0x78] sm:$0xff]  }
   0x7   :  { %322 = vmatpush3.bf16.msra.mxu0 %v388_v3  ;;  %344 = vmatpush3.bf16.msra.mxu1 %v388_v3  ;;  %v49_v16 = vunpack.c.l.bf16 %v47_v13  ;;  %v400_v25 = vld [vmem:[%s490_s0 + $0x38] sm:$0xff]  }
   0x8   :  { %323 = vmatprep.subr.bf16.mxu0 %v389_v4  ;;  %345 = vmatprep.subr.bf16.mxu1 %v389_v4  ;;  %v48_v19 = vunpack.c.l.bf16 %v46_v14 }
   0x9   :  { %v51_v18 = vsub.f32 %v13_v12, %v49_v16  ;;  %222 = vmatprep.mubr.bf16.mxu1 %v47_v13 }
   0xa   :  { %v50_v24 = vsub.f32 %v12_v11, %v48_v19 }
   0xb   :  { %324 = vmatpush3.bf16.msra.mxu0 %v390_v5  ;;  %346 = vmatpush3.bf16.msra.mxu1 %v390_v5  ;;  %v53_v21 = vpack.c.bf16 %v51_v18, %v51_v18 }
   0xc   :  { %325 = vmatprep.subr.bf16.mxu0 %v391_v6  ;;  %347 = vmatprep.subr.bf16.mxu1 %v391_v6  ;;  %v52_v27 = vpack.c.bf16 %v50_v24, %v50_v24 }
   0xd   :  { %182 = vmatprep.mubr.bf16.mxu0 %v53_v21  ;;  %v231_v23 = vunpack.c.l.bf16 %v53_v21 }
   0xe   :  { %v230_v29 = vunpack.c.l.bf16 %v52_v27 }
   0xf   :  { %326 = vmatpush3.bf16.msra.mxu0 %v392_v7  ;;  %348 = vmatpush3.bf16.msra.mxu1 %v392_v7  ;;  %v233_v26 = vsub.f32 %v51_v18, %v231_v23 }
  0x10   :  { %327 = vmatprep.subr.bf16.mxu0 %v393_v8  ;;  %349 = vmatprep.subr.bf16.mxu1 %v393_v8  ;;  %v232_v30 = vsub.f32 %v50_v24, %v230_v29 }
  0x11   :  { %v235_v28 = vpack.c.bf16 %v233_v26, %v233_v26 }
  0x12   :  { %v234_v31 = vpack.c.bf16 %v232_v30, %v232_v30 }
  0x13   :  { %328 = vmatpush3.bf16.msra.mxu0 %v394_v9  ;;  %350 = vmatpush3.bf16.msra.mxu1 %v394_v9 }
  0x14   :  { %329 = vmatprep.subr.bf16.mxu0 %v395_v10  ;;  %351 = vmatprep.subr.bf16.mxu1 %v395_v10 }
  0x17   :  { %330 = vmatpush3.bf16.msra.mxu0 %v396_v15  ;;  %352 = vmatpush3.bf16.msra.mxu1 %v396_v15 }
  0x18   :  { %331 = vmatprep.subr.bf16.mxu0 %v397_v17  ;;  %353 = vmatprep.subr.bf16.mxu1 %v397_v17 }
  0x1b   :  { %332 = vmatpush3.bf16.msra.mxu0 %v398_v20  ;;  %354 = vmatpush3.bf16.msra.mxu1 %v398_v20 }
  0x1c   :  { %333 = vmatprep.subr.bf16.mxu0 %v399_v22  ;;  %355 = vmatprep.subr.bf16.mxu1 %v399_v22 }
  0x1f   :  { %334 = vmatpush3.bf16.msra.mxu0 %v400_v25  ;;  %356 = vmatpush3.bf16.msra.mxu1 %v400_v25 }
  0x20   :  { %363 = vmatprep.subr.bf16.mxu0 %v421_v0 }
  0x22   :  { %183 = vmatmul.mubr.bf16.vlgmr.msra.gmra.mrb[0].mxu0 %v52_v27  ;;  %223 = vmatmul.mubr.bf16.vlgmr.msra.gmra.mrb[0].mxu1 %v46_v14 }
  0x23   :  { %364 = vmatpush3.bf16.msra.mxu0 %v426_v1  ;;  %268 = vmatprep.mubr.bf16.mxu0 %v235_v28 }
  0x24   :  { %365 = vmatprep.subr.bf16.mxu0 %v433_v2 }
  0x27   :  { %366 = vmatpush3.bf16.msra.mxu0 %v388_v3 }
  0x28   :  { %367 = vmatprep.subr.bf16.mxu0 %v389_v4 }
  0x2b   :  { %368 = vmatpush3.bf16.msra.mxu0 %v390_v5 }
  0x2c   :  { %369 = vmatprep.subr.bf16.mxu0 %v391_v6 }
  0x2f   :  { %370 = vmatpush3.bf16.msra.mxu0 %v392_v7 }
  0x30   :  { %371 = vmatprep.subr.bf16.mxu0 %v393_v8 }
  0x33   :  { %372 = vmatpush3.bf16.msra.mxu0 %v394_v9 }
  0x34   :  { %373 = vmatprep.subr.bf16.mxu0 %v395_v10 }
  0x37   :  { %374 = vmatpush3.bf16.msra.mxu0 %v396_v15 }
  0x38   :  { %375 = vmatprep.subr.bf16.mxu0 %v397_v17 }
  0x3b   :  { %376 = vmatpush3.bf16.msra.mxu0 %v398_v20 }
  0x3c   :  { %377 = vmatprep.subr.bf16.mxu0 %v399_v22 }
  0x3f   :  { %378 = vmatpush3.bf16.msra.mxu0 %v400_v25 }
  0x42   :  { %269 = vmatmul.mubr.bf16.vlgmr.msra.gmra.mrb[4].mxu0 %v234_v31 }
  0xf5   :  { %v335_v32 = vpop.f32.mrb[0].mxu0  ;;  %v357_v33 = vpop.f32.mrb[0].mxu1 }
  0xf6   :  { %v336_v34 = vpop.f32.mrb[1].mxu0  ;;  %v358_v35 = vpop.f32.mrb[1].mxu1 }
  0xf7   :  { %v337_v36 = vadd.f32 %v336_v34, %v335_v32  ;;  %v359_v37 = vadd.f32 %v358_v35, %v357_v33  ;;  %v338_v38 = vpop.f32.mrb[2].mxu0  ;;  %v360_v39 = vpop.f32.mrb[2].mxu1 }
  0xf8   :  { %v339_v40 = vpop.f32.mrb[3].mxu0  ;;  %v361_v41 = vpop.f32.mrb[3].mxu1 }
  0xf9   :  { %v225_v42 = vadd.f32 %v359_v37, %v337_v36 }
 0x115   :  { %v379_v43 = vpop.f32.mrb[4].mxu0 }
 0x116   :  { %v380_v44 = vpop.f32.mrb[5].mxu0 }
 0x117   :  { %v381_v45 = vadd.f32 %v380_v44, %v379_v43  ;;  %v382_v46 = vpop.f32.mrb[6].mxu0 }
 0x118   :  { %v383_v47 = vpop.f32.mrb[7].mxu0 }
 0x119   :  { %v276_v48 = vadd.f32 %v381_v45, %v225_v42 }
 0x11b   :  { %v277_v49 = vmul.f32 0.0625, %v276_v48 }
 0x11d   :  { %v279_v50 = vsel %vm278_vm0, %v277_v49, 0.0 }
 0x11e   :  { %280 = vadd.xlane.f32.xlu0 %v279_v50 }
 0x1ab   :  { %v281_v51 = vpop.xlane.xlu0 %280 }
 0x1ac   :  { %v283_v52 = vmul.f32 0.0625, %v281_v51 }
 0x1ae   :  { %v284_v53 = vsub.f32 %v277_v49, %v283_v52 }
 0x1b0   :  { %v285_v54 = vmul.f32 %v284_v53, %v284_v53 }
 0x1b2   :  { %v286_v55 = vsel %vm278_vm0, %v285_v54, 0.0 }
 0x1b3   :  { %287 = vadd.xlane.f32.xlu0 %v286_v55 }
 0x240   :  { %v288_v56 = vpop.xlane.xlu0 %287 }
 0x241   :  { %v289_v57 = vmul.f32 0.06666667, %v288_v56 }
 0x243   :  { %401 = vrsqrt.f32 %v289_v57  ;;  %vm292_vm2 = vcmp.eq.f32.partialorder %v289_v57, inf  ;;  %v295_v60 = vand.u32 2147483648, %v289_v57  ;;  %vm294_vm3 = vcmp.eq.f32.partialorder %v289_v57, 0.0 }
 0x24d   :  { %v402_v58 = vpop.eup %401 }
 0x24e   :  { %v291_v59 = vmul.f32 %v402_v58, %v289_v57 }
 0x250   :  { %v293_v61 = vsel %vm292_vm2, %v289_v57, %v291_v59 }
 0x251   :  { %v296_v62 = vsel %vm294_vm3, %v295_v60, %v293_v61 }
 0x252   :  { %298 = vst.msk [vmem:[%s492_s2] sm:$0xff] %vm297_vm1, %v296_v62 }

</bundles_post_ra>
